<compile_context>
chip_gen: v5e
topology: v5e:2x2
jax: 0.10.0
libtpu: 0.0.40
codegen_flags: <defaults>
</compile_context>

<pallas_src>
import numpy as np
import jax
import jax.numpy as jnp
from jax.experimental import pallas as pl
from jax.experimental.pallas import tpu as pltpu


def _bilinear_matrix(out_size: int, in_size: int) -> jnp.ndarray:
    """Interpolation matrix M (out_size, in_size): y = M @ x, bilinear,
    align_corners=False (PyTorch F.interpolate semantics)."""
    scale = in_size / out_size
    dst = jnp.arange(out_size, dtype=jnp.float32)
    src = (dst + 0.5) * scale - 0.5
    src = jnp.clip(src, 0.0, float(in_size - 1))
    lo = jnp.floor(src).astype(jnp.int32)
    hi = jnp.minimum(lo + 1, in_size - 1)
    frac = src - lo.astype(jnp.float32)
    rows = jnp.arange(out_size)
    m = jnp.zeros((out_size, in_size), dtype=jnp.float32)
    m = m.at[rows, lo].add(1.0 - frac)
    m = m.at[rows, hi].add(frac)
    return m


def _vmem_capacity_bytes() -> int:
    """Per-generation VMEM capacity (128 MiB v5e/v6e, 64 MiB v7x); conservative
    fallback if the query is unavailable."""
    try:
        info = pltpu.get_tpu_info()
        cap = int(getattr(info, "vmem_capacity_bytes", 0))
        if cap > 0:
            return cap
    except Exception:
        pass
    return 64 << 20          # conservative: v7x per-TensorCore VMEM


def _resize_normalize_kernel(scale_ref, bias_ref, x_ref, rh_ref, rwt_ref, o_ref):
    # scale_ref, bias_ref : (num_planes,) f32 SMEM  (per-plane 1/std, -mean/std)
    # x_ref  : (1, B*H, W)  f32  VMEM  -- B image planes stacked along rows
    # rh_ref : (Ho, H)      bf16 VMEM  -- resident H-interpolation matrix
    # rwt_ref: (W, Wo)      bf16 VMEM  -- resident, pre-transposed W-interp
    # o_ref  : (B, Ho, Wo)  out_dtype VMEM
    g = pl.program_id(0)
    B, Ho, Wo = o_ref.shape
    H = rh_ref.shape[1]

    rwt = rwt_ref[...]                                   # (W, Wo) bf16
    rh = rh_ref[...]                                     # (Ho, H) bf16
    x_slab = x_ref[0].astype(rwt.dtype)                  # f32 -> bf16 inside VMEM

    # 1) W-resize for all B planes in ONE big MXU matmul (large M = B*H).
    tmp = jnp.dot(x_slab, rwt, preferred_element_type=jnp.float32)   # (B*H, Wo) f32

    # 2) Per-plane H-resize.  Scale folded into the f32->bf16 cast in the
    #    (H, Wo) domain; only the bias add remains in the (Ho, Wo) epilogue.
    for b in range(B):                                   # static unroll, B small
        s = scale_ref[g * B + b]
        t = bias_ref[g * B + b]
        plane = (tmp[b * H:(b + 1) * H, :] * s).astype(rwt.dtype)      # (H, Wo)
        yb = jnp.dot(rh, plane, preferred_element_type=jnp.float32)    # (Ho, Wo)
        o_ref[b] = (yb + t).astype(o_ref.dtype)


def preprocessing_model(x, resize, mean, std, *,
                        max_planes_per_step=8,
                        compute_dtype=jnp.bfloat16,
                        out_dtype=None):
    """x: (N, C, H, W) float32; returns (N, C, resize, resize) in `out_dtype`
    (defaults to x.dtype for module-faithful semantics; pass jnp.bfloat16 to
    halve the output HBM writeback when the downstream model consumes bf16)."""
    N, C, H, W = x.shape
    Ho = Wo = int(resize)
    num_planes = N * C
    out_dtype = x.dtype if out_dtype is None else out_dtype

    in_itemsize = int(np.dtype(x.dtype).itemsize)
    cd_itemsize = int(np.dtype(compute_dtype).itemsize)
    out_itemsize = int(np.dtype(out_dtype).itemsize)

    # Interpolation matrices (rw pre-transposed so the kernel never transposes).
    rh = _bilinear_matrix(Ho, H).astype(compute_dtype)        # (Ho, H)
    rwt = _bilinear_matrix(Wo, W).T.astype(compute_dtype)     # (W, Wo)

    # ---- Honest, per-generation VMEM budget -------------------------------
    vmem_cap = _vmem_capacity_bytes()
    vmem_limit = max(32 << 20, min(vmem_cap - (8 << 20), 112 << 20))
    resident_bytes = 2 * (Ho * H + W * Wo) * cd_itemsize      # rh + rwt buffers

    def footprint(b):
        return (2 * b * H * W * in_itemsize        # input block, double-buffered
                + b * H * W * cd_itemsize          # in-VMEM bf16 copy of the slab
                + b * H * Wo * 4                   # stage-1 f32 result
                + H * Wo * cd_itemsize             # per-plane scaled bf16 slab
                + Ho * Wo * 4                      # per-plane f32 accumulator
                + 2 * b * Ho * Wo * out_itemsize)  # output block, double-buffered

    block_budget = vmem_limit - resident_bytes - (2 << 20)

    B = max(1, min(num_planes, int(max_planes_per_step)))
    if num_planes >= 2:
        # Keep G >= 2 grid steps so the "parallel" axis can be split across
        # v7x's two TensorCores (no effect on single-TC v5e/v6e).
        B = min(B, -(-num_planes // 2))
    while B > 1 and footprint(B) > block_budget:
        B -= 1
    while num_planes % B:
        # B must divide num_planes so x can be regrouped by pure reshapes
        # (no pad/concatenate HBM copy of the input).
        B -= 1
    G = num_planes // B

    # Pure views of the NCHW input — no HBM copy, no dtype-cast round trip.
    x_slabs = x.reshape(G, B * H, W)

    # Per-plane normalization constants (scale folded pre-stage-2, bias after).
    mean = jnp.asarray(mean, jnp.float32)                     # (C,)
    std = jnp.asarray(std, jnp.float32)                       # (C,)
    istd = 1.0 / std
    scale = jnp.tile(istd, (N,))                              # (N*C,)
    bias = jnp.tile(-mean * istd, (N,))                       # (N*C,)

    out_flat = pl.pallas_call(
        _resize_normalize_kernel,
        out_shape=jax.ShapeDtypeStruct((num_planes, Ho, Wo), out_dtype),
        grid_spec=pltpu.PrefetchScalarGridSpec(
            num_scalar_prefetch=0,
            grid=(G,),
            in_specs=[
                pl.BlockSpec(memory_space=pltpu.SMEM),            # scale per plane
                pl.BlockSpec(memory_space=pltpu.SMEM),            # bias  per plane
                pl.BlockSpec((1, B * H, W), lambda g: (g, 0, 0)), # B input planes
                pl.BlockSpec((Ho, H), lambda g: (0, 0)),          # R_h (resident)
                pl.BlockSpec((W, Wo), lambda g: (0, 0)),          # R_w^T (resident)
            ],
            out_specs=pl.BlockSpec((B, Ho, Wo), lambda g: (g, 0, 0)),
        ),
        compiler_params=pltpu.CompilerParams(
            dimension_semantics=("parallel",),
            vmem_limit_bytes=int(vmem_limit),
        ),
    )(scale, bias, x_slabs, rh, rwt)

    return out_flat.reshape(N, C, Ho, Wo)


def _reference_f32(x, resize, mean, std):
    """Pure-JAX f32 reference: bilinear resize + normalize (semantic check)."""
    N, C, H, W = x.shape
    Ho = Wo = int(resize)
    rh = _bilinear_matrix(Ho, H)
    rwt = _bilinear_matrix(Wo, W).T
    y = jnp.einsum('nchw,wp->nchp', x.astype(jnp.float32), rwt)
    y = jnp.einsum('oh,nchp->ncop', rh, y)
    mean = jnp.asarray(mean, jnp.float32).reshape(1, C, 1, 1)
    std = jnp.asarray(std, jnp.float32).reshape(1, C, 1, 1)
    return (y - mean) / std


def _reference_matched(x, resize, mean, std, compute_dtype=jnp.bfloat16):
    """Replicates the kernel's bf16 compute path in plain JAX (tight check)."""
    N, C, H, W = x.shape
    Ho = Wo = int(resize)
    rh = _bilinear_matrix(Ho, H).astype(compute_dtype)
    rwt = _bilinear_matrix(Wo, W).T.astype(compute_dtype)
    xf = x.reshape(N * C, H, W).astype(compute_dtype)
    tmp = jnp.einsum('nhw,wp->nhp', xf, rwt, preferred_element_type=jnp.float32)
    istd = 1.0 / jnp.asarray(std, jnp.float32)
    scale = jnp.tile(istd, (N,)).reshape(N * C, 1, 1)
    bias = jnp.tile(-jnp.asarray(mean, jnp.float32) * istd, (N,)).reshape(N * C, 1, 1)
    tmp = (tmp * scale).astype(compute_dtype)
    y = jnp.einsum('oh,nhp->nop', rh, tmp, preferred_element_type=jnp.float32)
    return (y + bias).reshape(N, C, Ho, Wo)


if __name__ == "__main__":
    key = jax.random.PRNGKey(0)
    N, C, H, W = 2, 3, 32, 32
    resize = 128                      # multiple of 128 -> lane-dense output stores
    mean = [0.485, 0.456, 0.406]
    std = [0.229, 0.224, 0.225]

    x = jax.random.uniform(key, (N, C, H, W), dtype=jnp.float32)

    # Default path: float32 output (module-faithful).  6 planes -> B=3, G=2
    # (exercises the multi-group path; both v7x TCs usable).
    out = preprocessing_model(x, resize, mean, std)
    out = jax.block_until_ready(out)
    assert out.shape == (N, C, resize, resize), out.shape
    assert out.dtype == jnp.float32, out.dtype

    # Tight structural check against a reference that follows the same bf16
    # compute path (only accumulation-order differences expected).
    ref_matched = _reference_matched(x, resize, mean, std)
    err_matched = float(jnp.max(jnp.abs(out - ref_matched)))
    assert err_matched < 2e-3, err_matched

    # Semantic check against the full-f32 reference; tolerance accounts for
    # the bf16 input/weight casts (values normalized by std ~0.22).
    ref_f32 = _reference_f32(x, resize, mean, std)
    err_sem = float(jnp.max(jnp.abs(out - ref_f32)))
    assert err_sem < 5e-2, err_sem

    # bf16-output path (downstream bf16 consumers): halves HBM writeback,
    # which dominates traffic for upsampling.
    out_bf16 = preprocessing_model(x, resize, mean, std, out_dtype=jnp.bfloat16)
    out_bf16 = jax.block_until_ready(out_bf16)
    assert out_bf16.dtype == jnp.bfloat16, out_bf16.dtype
    err_bf16 = float(jnp.max(jnp.abs(out_bf16.astype(jnp.float32) - out)))
    assert err_bf16 < 2e-2, err_bf16

    print("KERNEL_OK")
</pallas_src>

<mosaic_0001>
module attributes {stable_mosaic.version = 11 : i64} {
  func.func @_resize_normalize_kernel(%arg0: i32, %arg1: memref<6xf32, #tpu.memory_space<smem>>, %arg2: memref<6xf32, #tpu.memory_space<smem>>, %arg3: memref<1x96x32xf32, #tpu.memory_space<vmem>>, %arg4: memref<128x32xbf16, #tpu.memory_space<vmem>>, %arg5: memref<32x128xbf16, #tpu.memory_space<vmem>>, %arg6: memref<3x128x128xf32, #tpu.memory_space<vmem>>) attributes {dimension_semantics = [#tpu.dimension_semantics<parallel>], iteration_bounds = array<i64: 2>, scalar_prefetch = 0 : i64, scratch_operands = 0 : i64, tpu.core_type = #tpu.core_type<tc>, window_params = [{transform_indices = @transform_0, window_bounds = array<i64: 6>}, {transform_indices = @transform_1, window_bounds = array<i64: 6>}, {transform_indices = @transform_2, window_bounds = array<i64: 1, 96, 32>}, {pipeline_mode = #tpu.pipeline_mode<synchronous>, transform_indices = @transform_3, window_bounds = array<i64: 128, 32>}, {pipeline_mode = #tpu.pipeline_mode<synchronous>, transform_indices = @transform_4, window_bounds = array<i64: 32, 128>}, {transform_indices = @transform_5, window_bounds = array<i64: 3, 128, 128>}]} {
    %c0 = arith.constant 0 : index
    %c0_0 = arith.constant 0 : index
    %0 = vector.load %arg5[%c0, %c0_0] : memref<32x128xbf16, #tpu.memory_space<vmem>>, vector<32x128xbf16>
    %c0_1 = arith.constant 0 : index
    %c0_2 = arith.constant 0 : index
    %1 = vector.load %arg4[%c0_1, %c0_2] : memref<128x32xbf16, #tpu.memory_space<vmem>>, vector<128x32xbf16>
    %c0_3 = arith.constant 0 : index
    %c0_4 = arith.constant 0 : index
    %c0_5 = arith.constant 0 : index
    %2 = vector.load %arg3[%c0_3, %c0_4, %c0_5] : memref<1x96x32xf32, #tpu.memory_space<vmem>>, vector<1x96x32xf32>
    %3 = vector.shape_cast %2 : vector<1x96x32xf32> to vector<96x32xf32>
    %4 = arith.truncf %3 : vector<96x32xf32> to vector<96x32xbf16>
    %cst = arith.constant dense<0.000000e+00> : vector<96x128xf32>
    %5 = tpu.matmul %4, %0, %cst {dimension_numbers = #tpu.dot_dimension_numbers<[1], [0], [0], [1], [0, 0, 1, 1], [], []>} : vector<96x32xbf16>, vector<32x128xbf16>, vector<96x128xf32> -> vector<96x128xf32>
    %c3_i32 = arith.constant 3 : i32
    %6 = arith.muli %arg0, %c3_i32 : i32
    %c0_i32 = arith.constant 0 : i32
    %7 = arith.addi %6, %c0_i32 : i32
    %8 = arith.index_cast %7 : i32 to index
    %9 = memref.load %arg1[%8] : memref<6xf32, #tpu.memory_space<smem>>
    %c3_i32_6 = arith.constant 3 : i32
    %10 = arith.muli %arg0, %c3_i32_6 : i32
    %c0_i32_7 = arith.constant 0 : i32
    %11 = arith.addi %10, %c0_i32_7 : i32
    %12 = arith.index_cast %11 : i32 to index
    %13 = memref.load %arg2[%12] : memref<6xf32, #tpu.memory_space<smem>>
    %14 = vector.extract_strided_slice %5 {offsets = [0, 0], sizes = [32, 128], strides = [1, 1]} : vector<96x128xf32> to vector<32x128xf32>
    %15 = vector.broadcast %9 : f32 to vector<32x128xf32>
    %16 = arith.mulf %14, %15 : vector<32x128xf32>
    %17 = arith.truncf %16 : vector<32x128xf32> to vector<32x128xbf16>
    %cst_8 = arith.constant dense<0.000000e+00> : vector<128x128xf32>
    %18 = tpu.matmul %1, %17, %cst_8 {dimension_numbers = #tpu.dot_dimension_numbers<[1], [0], [0], [1], [0, 0, 1, 1], [], []>} : vector<128x32xbf16>, vector<32x128xbf16>, vector<128x128xf32> -> vector<128x128xf32>
    %19 = vector.broadcast %13 : f32 to vector<128x128xf32>
    %20 = arith.addf %18, %19 : vector<128x128xf32>
    %c0_9 = arith.constant 0 : index
    %c0_10 = arith.constant 0 : index
    %c0_11 = arith.constant 0 : index
    %21 = vector.load %arg6[%c0_9, %c0_10, %c0_11] : memref<3x128x128xf32, #tpu.memory_space<vmem>>, vector<1x128x128xf32>
    %22 = vector.shape_cast %21 : vector<1x128x128xf32> to vector<128x128xf32>
    %23 = vector.shape_cast %20 : vector<128x128xf32> to vector<1x128x128xf32>
    tpu.vector_store %arg6[%c0_9, %c0_10, %c0_11], %23 {strides = array<i32>} : memref<3x128x128xf32, #tpu.memory_space<vmem>>, vector<1x128x128xf32>,
    %c3_i32_12 = arith.constant 3 : i32
    %24 = arith.muli %arg0, %c3_i32_12 : i32
    %c1_i32 = arith.constant 1 : i32
    %25 = arith.addi %24, %c1_i32 : i32
    %26 = arith.index_cast %25 : i32 to index
    %27 = memref.load %arg1[%26] : memref<6xf32, #tpu.memory_space<smem>>
    %c3_i32_13 = arith.constant 3 : i32
    %28 = arith.muli %arg0, %c3_i32_13 : i32
    %c1_i32_14 = arith.constant 1 : i32
    %29 = arith.addi %28, %c1_i32_14 : i32
    %30 = arith.index_cast %29 : i32 to index
    %31 = memref.load %arg2[%30] : memref<6xf32, #tpu.memory_space<smem>>
    %32 = vector.extract_strided_slice %5 {offsets = [32, 0], sizes = [32, 128], strides = [1, 1]} : vector<96x128xf32> to vector<32x128xf32>
    %33 = vector.broadcast %27 : f32 to vector<32x128xf32>
    %34 = arith.mulf %32, %33 : vector<32x128xf32>
    %35 = arith.truncf %34 : vector<32x128xf32> to vector<32x128xbf16>
    %cst_15 = arith.constant dense<0.000000e+00> : vector<128x128xf32>
    %36 = tpu.matmul %1, %35, %cst_15 {dimension_numbers = #tpu.dot_dimension_numbers<[1], [0], [0], [1], [0, 0, 1, 1], [], []>} : vector<128x32xbf16>, vector<32x128xbf16>, vector<128x128xf32> -> vector<128x128xf32>
    %37 = vector.broadcast %31 : f32 to vector<128x128xf32>
    %38 = arith.addf %36, %37 : vector<128x128xf32>
    %c1 = arith.constant 1 : index
    %c0_16 = arith.constant 0 : index
    %c0_17 = arith.constant 0 : index
    %39 = vector.load %arg6[%c1, %c0_16, %c0_17] : memref<3x128x128xf32, #tpu.memory_space<vmem>>, vector<1x128x128xf32>
    %40 = vector.shape_cast %39 : vector<1x128x128xf32> to vector<128x128xf32>
    %41 = vector.shape_cast %38 : vector<128x128xf32> to vector<1x128x128xf32>
    tpu.vector_store %arg6[%c1, %c0_16, %c0_17], %41 {strides = array<i32>} : memref<3x128x128xf32, #tpu.memory_space<vmem>>, vector<1x128x128xf32>,
    %c3_i32_18 = arith.constant 3 : i32
    %42 = arith.muli %arg0, %c3_i32_18 : i32
    %c2_i32 = arith.constant 2 : i32
    %43 = arith.addi %42, %c2_i32 : i32
    %44 = arith.index_cast %43 : i32 to index
    %45 = memref.load %arg1[%44] : memref<6xf32, #tpu.memory_space<smem>>
    %c3_i32_19 = arith.constant 3 : i32
    %46 = arith.muli %arg0, %c3_i32_19 : i32
    %c2_i32_20 = arith.constant 2 : i32
    %47 = arith.addi %46, %c2_i32_20 : i32
    %48 = arith.index_cast %47 : i32 to index
    %49 = memref.load %arg2[%48] : memref<6xf32, #tpu.memory_space<smem>>
    %50 = vector.extract_strided_slice %5 {offsets = [64, 0], sizes = [32, 128], strides = [1, 1]} : vector<96x128xf32> to vector<32x128xf32>
    %51 = vector.broadcast %45 : f32 to vector<32x128xf32>
    %52 = arith.mulf %50, %51 : vector<32x128xf32>
    %53 = arith.truncf %52 : vector<32x128xf32> to vector<32x128xbf16>
    %cst_21 = arith.constant dense<0.000000e+00> : vector<128x128xf32>
    %54 = tpu.matmul %1, %53, %cst_21 {dimension_numbers = #tpu.dot_dimension_numbers<[1], [0], [0], [1], [0, 0, 1, 1], [], []>} : vector<128x32xbf16>, vector<32x128xbf16>, vector<128x128xf32> -> vector<128x128xf32>
    %55 = vector.broadcast %49 : f32 to vector<128x128xf32>
    %56 = arith.addf %54, %55 : vector<128x128xf32>
    %c2 = arith.constant 2 : index
    %c0_22 = arith.constant 0 : index
    %c0_23 = arith.constant 0 : index
    %57 = vector.load %arg6[%c2, %c0_22, %c0_23] : memref<3x128x128xf32, #tpu.memory_space<vmem>>, vector<1x128x128xf32>
    %58 = vector.shape_cast %57 : vector<1x128x128xf32> to vector<128x128xf32>
    %59 = vector.shape_cast %56 : vector<128x128xf32> to vector<1x128x128xf32>
    tpu.vector_store %arg6[%c2, %c0_22, %c0_23], %59 {strides = array<i32>} : memref<3x128x128xf32, #tpu.memory_space<vmem>>, vector<1x128x128xf32>,
    return
  }
  func.func @transform_0(%arg0: i32) -> i32 {
    %c0_i32 = arith.constant 0 : i32
    %c0_i32_0 = arith.constant 0 : i32
    return %c0_i32 : i32
  }
  func.func @transform_1(%arg0: i32) -> i32 {
    %c0_i32 = arith.constant 0 : i32
    %c0_i32_0 = arith.constant 0 : i32
    return %c0_i32 : i32
  }
  func.func @transform_2(%arg0: i32) -> (i32, i32, i32) {
    %c0_i32 = arith.constant 0 : i32
    %c0_i32_0 = arith.constant 0 : i32
    %c0_i32_1 = arith.constant 0 : i32
    return %arg0, %c0_i32, %c0_i32_0 : i32, i32, i32
  }
  func.func @transform_3(%arg0: i32) -> (i32, i32) {
    %c0_i32 = arith.constant 0 : i32
    %c0_i32_0 = arith.constant 0 : i32
    %c0_i32_1 = arith.constant 0 : i32
    return %c0_i32, %c0_i32_0 : i32, i32
  }
  func.func @transform_4(%arg0: i32) -> (i32, i32) {
    %c0_i32 = arith.constant 0 : i32
    %c0_i32_0 = arith.constant 0 : i32
    %c0_i32_1 = arith.constant 0 : i32
    return %c0_i32, %c0_i32_0 : i32, i32
  }
  func.func @transform_5(%arg0: i32) -> (i32, i32, i32) {
    %c0_i32 = arith.constant 0 : i32
    %c0_i32_0 = arith.constant 0 : i32
    %c0_i32_1 = arith.constant 0 : i32
    return %arg0, %c0_i32, %c0_i32_0 : i32, i32, i32
  }
}

</mosaic_0001>

<bundles_post_ra>
// kernel: tpu_custom_call.1
= control target key start
LH: loop header
LB: loop body
LE: loop exit
PB: predicated region body
PF: predicated region fallthrough
CT: control target
= control target key end

     0   :  { %10 = vsyncpa [#allocation4], 0  ;;  %s1369_s0 = inlined_call_operand.vmem [shape: f32[6], index: 0, kind: input, shape index: {}]   ;;  %s1370_s1 = inlined_call_operand.vmem [shape: f32[6], index: 1, kind: input, shape index: {}]   ;;  %s1371_s2 = inlined_call_operand.vmem [shape: f32[2,96,32], index: 2, kind: input, shape index: {}]   ;;  %s1372_s3 = inlined_call_operand.vmem [shape: bf16[128,32], index: 3, kind: input, shape index: {}]   ;;  %s1373_s4 = inlined_call_operand.vmem [shape: bf16[32,128], index: 4, kind: input, shape index: {}]   ;;  %s1374_s5 = inlined_call_operand.hbm [shape: f32[6,128,128], index: 5, kind: output, shape index: {}]  }
   0x1   :  { %11 = vsyncpa [#allocation6], 0 }
   0x2   :  { %12 = vsyncpa [#allocation3], 0 }
   0x3   :  { %14 = vsyncpa [#allocation3 + $0x1], 0  ;;  %s1083_s18 = smov 0   ;;  %s1085_s19 = smov 0  }
   0x4   :  { %s1087_s20 = smov 0   ;;  %s1089_s21 = smov 0  }
   0x5 LB: > { %s1104_s22 = sadd.s32 4294967295, %s1047_s21   ;;  %s755_s23 = sadd.s32 4294967294, %s1047_s21   ;;  %s1047_s21 = sphi %s1089_s21, %s1380_s21   ;;  %s1043_s20 = sphi %s1087_s20, %s1379_s20   ;;  %s1039_s19 = sphi %s1085_s19, %s1378_s19   ;;  %s1035_s18 = sphi %s1083_s18, %s1377_s18  }
   0x6   : > { %s1108_s24 = sadd.s32 1, %s1047_s21   ;;  %s137_s25 = sadd.s32 1, %s1043_s20 }
   0x7   : > { %s134_s26 = ssub.s32 %s1047_s21, %s1108_s24  ;;  %p147_p0 = scmp.ne.s32.totalorder %s1043_s20, %s1039_s19 }
   0x8   : > { %p135_p1 = scmp.eq.s32.totalorder %s134_s26, 0  ;;  %p148_p2 = scmp.eq.s32.totalorder %s1104_s22, 1 }
   0x9   : > { %p153_p3 = scmp.ne.s32.totalorder %s1039_s19, %s1035_s18  ;;  %p154_p4 = scmp.eq.s32.totalorder %s755_s23, 1 }
   0xa   : > { %s1119_s27 = scalar_select %p135_p1, %s1043_s20, %s137_s25  }
   0xb   : > { %p1121_p5 = por %p148_p2, %p147_p0  ;;  %p1125_p6 = por %p154_p4, %p153_p3 }
   0xc   : > { %p756_p7 = scmp.ge.s32.totalorder %s1047_s21, 1  ;;  %p161_p8 = scmp.lt.s32.totalorder %s1047_s21, 3 }
   0xd   : > { %p906_p9 = scmp.eq.s32.totalorder %s1104_s22, 0  ;;  %s173_s7 = sshll.u32 %s1369_s0, 4  ;;  %s174_s7 = int_to_ptr.vmem [resolvable:$true] %s173_s7 }
   0xe   : > { %p162_p10 = pnand %p756_p7, %p161_p8  ;;  %s183_s10 = sshll.u32 %s1370_s1, 4  ;;  %s184_s10 = int_to_ptr.vmem [resolvable:$true] %s183_s10 }
   0xf   : > { %s1049_s11 = smov [#allocation2]   ;;  %s1050_s12 = smov [#allocation5]  }
  0x10   : > { %p895_p11 = pneg %p162_p10 }
  0x11   : > { %210 = sbr.rel (%p162_p10) target bundleno = 520 (0x208), region = 40 }
  0x12   : > { %p896_p12 = pnand %p906_p9, %p895_p11 }
  0x14   : > { %898 = dma.vmem_to_smem (!%p896_p12), %s174_s7, 16, %s1049_s11, [#allocation4]  }
  0x15   : > { %901 = dma.vmem_to_smem (!%p896_p12), %s184_s10, 16, %s1050_s12, [#allocation6]  }
  0x16   : > { %1022 = dma.done.wait (%p906_p9), [#allocation4], 16  }
  0x17   : > { %1024 = vsyncadd (%p906_p9), [#allocation4], 4294967280 }
  0x18   : > { %1026 = dma.done.wait (%p906_p9), [#allocation6], 16  }
  0x19   : > { %1028 = vsyncadd (%p906_p9), [#allocation6], 4294967280 }
  0x1a   : > { %222 = sfence }
  0x1b   : > { %v871_v0 = vld [vmem:[%s1373_s4 + $0x8] sm:$0xff]  ;;  %p245_p13 = scmp.lt.s32.totalorder %s1104_s22, 1  ;;  %v870_v1 = vld [vmem:[%s1373_s4] sm:$0xff]  ;;  %vm302_vm0 = vcmask 261120   ;;  %s1166_s6 = smul.u32 3, %s1104_s22  ;;  %v874_v51 = vld [vmem:[%s1372_s3 + $0x10] sm:$0xff] }
  0x1c   : > { %327 = vmatpush.bf16.msra.mxu0 %v871_v0  ;;  %v872_v38 = vld [vmem:[%s1372_s3] sm:$0xff]  ;;  %v873_v45 = vld [vmem:[%s1372_s3 + $0x8] sm:$0xff]  ;;  %v875_v56 = vld [vmem:[%s1372_s3 + $0x18] sm:$0xff]  ;;  %s242_s16 = sand.u32 1, %s1039_s19  }
  0x1d   : > { %s246_s17 = scalar_select %p245_p13, %s1104_s22, 1  ;;  %v876_v57 = vld [vmem:[%s1372_s3 + $0x20] sm:$0xff]  ;;  %v877_v58 = vld [vmem:[%s1372_s3 + $0x28] sm:$0xff]  ;;  %v878_v59 = vld [vmem:[%s1372_s3 + $0x30] sm:$0xff] }
  0x1e   : > { %s361_s7 = sld [smem:[#allocation2 + %s1166_s6]]  ;;  %s500_s8 = sadd.s32 1, %s1166_s6  ;;  %v879_v60 = vld [vmem:[%s1372_s3 + $0x38] sm:$0xff] }
  0x1f   : > { %s884_s23 = smul.u32 96, %s246_s17  ;;  %s501_s9 = sld [smem:[#allocation2 + %s500_s8]] }
  0x20   : > { %328 = vmatpush.bf16.msra.mxu0 %v870_v1  ;;  %s577_s14 = sadd.s32 2, %s1166_s6  ;;  %s883_s17 = smul.u32 384, %s242_s16 }
  0x21   : > { %s249_s30 = scalar_lea.vmem %s1371_s2, %s884_s23  ;;  %s578_s15 = sld [smem:[#allocation2 + %s577_s14]] }
  0x22   : > { %v272_v2 = vld [vmem:[%s249_s30] sm:$0xff]  ;;  %v273_v3 = vld [vmem:[%s249_s30 + $0x8] sm:$0xff]  ;;  %v274_v5 = vld [vmem:[%s249_s30 + $0x10] sm:$0xff]  ;;  %s1228_s23 = scalar_lea.vmem [#allocation7], %s883_s17  ;;  %s502_s25 = sld [smem:[#allocation5 + %s500_s8]] }
  0x23   : > { %v284_v4 = vpack.c.bf16 %v273_v3, %v272_v2  ;;  %v275_v6 = vld [vmem:[%s249_s30 + $0x18] sm:$0xff]  ;;  %v276_v8 = vld [vmem:[%s249_s30 + $0x20] sm:$0xff]  ;;  %v277_v9 = vld [vmem:[%s249_s30 + $0x28] sm:$0xff]  ;;  %s579_s8 = sld [smem:[#allocation5 + %s577_s14]]  ;;  %s655_s10 = scalar_lea.sflag [#allocation3], %s242_s16 }
  0x24   : > { %v285_v7 = vpack.c.bf16 %v275_v6, %v274_v5  ;;  %v286_v10 = vpack.c.bf16 %v277_v9, %v276_v8  ;;  %v278_v11 = vld [vmem:[%s249_s30 + $0x30] sm:$0xff]  ;;  %v279_v12 = vld [vmem:[%s249_s30 + $0x38] sm:$0xff]  ;;  %v280_v14 = vld [vmem:[%s249_s30 + $0x40] sm:$0xff]  ;;  %v363_v23 = vstv %s361_s7  ;;  %s668_s7 = sshll.u32 %s1228_s23, 4  ;;  %s669_s7 = int_to_ptr.vmem [resolvable:$true] %s668_s7 }
  0x25   : > { %772 = vmatmul.msk.bf16.vlgmr.msra.gmra.mxu0 %vm302_vm0, %v284_v4  ;;  %v287_v13 = vpack.c.bf16 %v279_v12, %v278_v11  ;;  %v281_v15 = vld [vmem:[%s249_s30 + $0x48] sm:$0xff]  ;;  %v282_v17 = vld [vmem:[%s249_s30 + $0x50] sm:$0xff]  ;;  %v283_v18 = vld [vmem:[%s249_s30 + $0x58] sm:$0xff]  ;;  %v503_v34 = vstv %s501_s9 }
  0x26   : > { %v288_v16 = vpack.c.bf16 %v281_v15, %v280_v14  ;;  %v289_v19 = vpack.c.bf16 %v283_v18, %v282_v17 }
  0x27   : > { %v580_v47 = vstv %s578_s15  ;;  %s362_s15 = sld [smem:[#allocation5 + %s1166_s6]]  ;;  %s882_s6 = smul.u32 384, %s1104_s22 }
  0x28   : > { %v1236_v2 = vstv %s502_s25 }
  0x29   : > { %s667_s30 = scalar_lea.hbm %s1374_s5, %s882_s6 }
  0x2a   : > { %s670_s9 = sshll.u32 %s667_s30, 4  ;;  %s671_s9 = int_to_ptr.hbm [resolvable:$true] %s670_s9 }
  0x2b   : > { %s991_s22 = sshra.s32 %s671_s9, 4  ;;  %s992_s22 = int_to_ptr.hbm [resolvable:$true] %s991_s22 }
  0x2c   : > { %s993_s11 = scalar_lea.hbm %s992_s22, 384  ;;  %p998_p3 = scmp.lt.s32.totalorder %s992_s22, %s1374_s5 }
  0x2d   : > { %v1225_v61 = vstv %s362_s15  ;;  %p994_p0 = scmp.ne.s32.totalorder %s992_s22, %s993_s11  ;;  %s997_s15 = scalar_lea.hbm %s1374_s5, 768 }
  0x2e   : > { %p999_p4 = scmp.lt.s32.totalorder %s997_s15, %s993_s11 }
  0x2f   : > { %p995_p1 = pnand %p994_p0, %p1121_p5 }
  0x30   : > { %p1000_p7 = por %p999_p4, %p998_p3 }
  0x31   : > { %p996_p2 = pneg %p995_p1 }
  0x33   : > { %p1001_p8 = pnand %p1000_p7, %p996_p2 }
  0x35   : > { %773 = vmatmul.msk.bf16.gmra.mxu0 %vm302_vm0, %v285_v7 }
  0x45   : > { %774 = vmatmul.msk.bf16.gmra.mxu0 %vm302_vm0, %v286_v10 }
  0x55   : > { %775 = vmatmul.msk.bf16.gmra.mxu0 %vm302_vm0, %v287_v13 }
  0x65   : > { %776 = vmatmul.msk.bf16.gmra.mxu0 %vm302_vm0, %v288_v16 }
  0x75   : > { %777 = vmatmul.msk.bf16.gmra.mxu0 %vm302_vm0, %v289_v19  ;;  %v1256_v19 = vstv %s579_s8 }
  0xa2   : > { %v330_v20 = vpop.f32.mrf.mxu0 }
  0xa3   : > { %v364_v29 = vmul.f32 %v363_v23, %v330_v20 }
  0xaa   : > { %v332_v21 = vpop.f32.mrf.mxu0 }
  0xab   : > { %v365_v27 = vmul.f32 %v363_v23, %v332_v21 }
  0xad   : > { %v368_v30 = vpack.c.bf16 %v365_v27, %v364_v29 }
  0xb2   : > { %v335_v22 = vpop.f32.mrf.mxu0 }
  0xb3   : > { %v366_v25 = vmul.f32 %v363_v23, %v335_v22 }
  0xba   : > { %v337_v24 = vpop.f32.mrf.mxu0 }
  0xbb   : > { %v367_v26 = vmul.f32 %v363_v23, %v337_v24 }
  0xbd   : > { %v369_v28 = vpack.c.bf16 %v367_v26, %v366_v25 }
  0xbf   : > { %441 = vmatpush.bf16.msra.mxu1 %v369_v28 }
  0xc2   : > { %v340_v31 = vpop.f32.mrf.mxu0 }
  0xc3   : > { %442 = vmatpush.bf16.msra.mxu1 %v368_v30  ;;  %v504_v41 = vmul.f32 %v503_v34, %v340_v31 }
  0xc6   : > { %810 = vmatmul.msk.bf16.vlgmr.msra.gmra.mxu1 %vm302_vm0, %v872_v38 }
  0xca   : > { %v342_v32 = vpop.f32.mrf.mxu0 }
  0xcb   : > { %v505_v39 = vmul.f32 %v503_v34, %v342_v32 }
  0xcd   : > { %v508_v42 = vpack.c.bf16 %v505_v39, %v504_v41 }
  0xd2   : > { %v345_v33 = vpop.f32.mrf.mxu0 }
  0xd3   : > { %v506_v36 = vmul.f32 %v503_v34, %v345_v33 }
  0xd6   : > { %811 = vmatmul.msk.bf16.gmra.mxu1 %vm302_vm0, %v873_v45 }
  0xda   : > { %v347_v35 = vpop.f32.mrf.mxu0 }
  0xdb   : > { %v507_v37 = vmul.f32 %v503_v34, %v347_v35 }
  0xdd   : > { %v509_v40 = vpack.c.bf16 %v507_v37, %v506_v36 }
  0xdf   : > { %517 = vmatpush.bf16.msra.mxu2 %v509_v40 }
  0xe2   : > { %v350_v43 = vpop.f32.mrf.mxu0 }
  0xe3   : > { %518 = vmatpush.bf16.msra.mxu2 %v508_v42  ;;  %v581_v54 = vmul.f32 %v580_v47, %v350_v43 }
  0xe6   : > { %818 = vmatmul.msk.bf16.vlgmr.msra.gmra.mxu2 %vm302_vm0, %v872_v38  ;;  %812 = vmatmul.msk.bf16.gmra.mxu1 %vm302_vm0, %v874_v51 }
  0xea   : > { %v352_v44 = vpop.f32.mrf.mxu0 }
  0xeb   : > { %v582_v52 = vmul.f32 %v580_v47, %v352_v44 }
  0xed   : > { %v585_v55 = vpack.c.bf16 %v582_v52, %v581_v54 }
  0xf2   : > { %v355_v46 = vpop.f32.mrf.mxu0 }
  0xf3   : > { %v583_v49 = vmul.f32 %v580_v47, %v355_v46 }
  0xf6   : > { %819 = vmatmul.msk.bf16.gmra.mxu2 %vm302_vm0, %v873_v45  ;;  %813 = vmatmul.msk.bf16.gmra.mxu1 %vm302_vm0, %v875_v56 }
  0xfa   : > { %v357_v48 = vpop.f32.mrf.mxu0 }
  0xfb   : > { %v584_v50 = vmul.f32 %v580_v47, %v357_v48 }
  0xfd   : > { %v586_v53 = vpack.c.bf16 %v584_v50, %v583_v49 }
  0xff   : > { %594 = vmatpush.bf16.msra.mxu3 %v586_v53 }
 0x103   : > { %595 = vmatpush.bf16.msra.mxu3 %v585_v55 }
 0x106   : > { %842 = vmatmul.msk.bf16.vlgmr.msra.gmra.mxu3 %vm302_vm0, %v872_v38  ;;  %820 = vmatmul.msk.bf16.gmra.mxu2 %vm302_vm0, %v874_v51 }
 0x107   : > { %814 = vmatmul.msk.bf16.gmra.mxu1 %vm302_vm0, %v876_v57 }
 0x116   : > { %843 = vmatmul.msk.bf16.gmra.mxu3 %vm302_vm0, %v873_v45  ;;  %821 = vmatmul.msk.bf16.gmra.mxu2 %vm302_vm0, %v875_v56 }
 0x117   : > { %815 = vmatmul.msk.bf16.gmra.mxu1 %vm302_vm0, %v877_v58 }
 0x126   : > { %844 = vmatmul.msk.bf16.gmra.mxu3 %vm302_vm0, %v874_v51  ;;  %822 = vmatmul.msk.bf16.gmra.mxu2 %vm302_vm0, %v876_v57 }
 0x127   : > { %816 = vmatmul.msk.bf16.gmra.mxu1 %vm302_vm0, %v878_v59 }
 0x136   : > { %845 = vmatmul.msk.bf16.gmra.mxu3 %vm302_vm0, %v875_v56  ;;  %823 = vmatmul.msk.bf16.gmra.mxu2 %vm302_vm0, %v877_v58 }
 0x137   : > { %817 = vmatmul.msk.bf16.gmra.mxu1 %vm302_vm0, %v879_v60 }
 0x143   : > { %v444_v62 = vpop.f32.mrf.mxu1 }
 0x144   : > { %v445_v63 = vadd.f32 %v444_v62, %v1225_v61 }
 0x146   : > { %846 = vmatmul.msk.bf16.gmra.mxu3 %vm302_vm0, %v876_v57  ;;  %824 = vmatmul.msk.bf16.gmra.mxu2 %vm302_vm0, %v878_v59  ;;  %484 = vst [vmem:[%s1228_s23] sm:$0xff] %v445_v63 }
 0x14b   : > { %v446_v0 = vpop.f32.mrf.mxu1 }
 0x14c   : > { %v447_v1 = vadd.f32 %v446_v0, %v1225_v61 }
 0x14e   : > { %485 = vst [vmem:[%s1228_s23 + $0x8] sm:$0xff] %v447_v1 }
 0x153   : > { %v449_v5 = vpop.f32.mrf.mxu1 }
 0x154   : > { %v450_v6 = vadd.f32 %v449_v5, %v1225_v61 }
 0x156   : > { %847 = vmatmul.msk.bf16.gmra.mxu3 %vm302_vm0, %v877_v58  ;;  %825 = vmatmul.msk.bf16.gmra.mxu2 %vm302_vm0, %v879_v60  ;;  %486 = vst [vmem:[%s1228_s23 + $0x10] sm:$0xff] %v450_v6 }
 0x15b   : > { %v451_v9 = vpop.f32.mrf.mxu1 }
 0x15c   : > { %v452_v10 = vadd.f32 %v451_v9, %v1225_v61 }
 0x15e   : > { %487 = vst [vmem:[%s1228_s23 + $0x18] sm:$0xff] %v452_v10 }
 0x163   : > { %v454_v13 = vpop.f32.mrf.mxu1 }
 0x164   : > { %v455_v14 = vadd.f32 %v454_v13, %v1225_v61 }
 0x166   : > { %848 = vmatmul.msk.bf16.gmra.mxu3 %vm302_vm0, %v878_v59  ;;  %488 = vst [vmem:[%s1228_s23 + $0x20] sm:$0xff] %v455_v14 }
 0x169   : > { %v520_v3 = vpop.f32.mrf.mxu2 }
 0x16a   : > { %v521_v4 = vadd.f32 %v520_v3, %v1236_v2 }
 0x16b   : > { %v456_v17 = vpop.f32.mrf.mxu1 }
 0x16c   : > { %826 = vst [vmem:[%s1228_s23 + $0x80] sm:$0xff] %v521_v4  ;;  %v457_v18 = vadd.f32 %v456_v17, %v1225_v61 }
 0x16e   : > { %489 = vst [vmem:[%s1228_s23 + $0x28] sm:$0xff] %v457_v18 }
 0x171   : > { %v522_v7 = vpop.f32.mrf.mxu2 }
 0x172   : > { %v523_v8 = vadd.f32 %v522_v7, %v1236_v2 }
 0x173   : > { %v459_v24 = vpop.f32.mrf.mxu1 }
 0x174   : > { %827 = vst [vmem:[%s1228_s23 + $0x88] sm:$0xff] %v523_v8  ;;  %v460_v25 = vadd.f32 %v459_v24, %v1225_v61 }
 0x176   : > { %849 = vmatmul.msk.bf16.gmra.mxu3 %vm302_vm0, %v879_v60  ;;  %490 = vst [vmem:[%s1228_s23 + $0x30] sm:$0xff] %v460_v25 }
 0x179   : > { %v525_v11 = vpop.f32.mrf.mxu2 }
 0x17a   : > { %v526_v12 = vadd.f32 %v525_v11, %v1236_v2 }
 0x17b   : > { %v461_v30 = vpop.f32.mrf.mxu1 }
 0x17c   : > { %828 = vst [vmem:[%s1228_s23 + $0x90] sm:$0xff] %v526_v12  ;;  %v462_v31 = vadd.f32 %v461_v30, %v1225_v61 }
 0x17e   : > { %491 = vst [vmem:[%s1228_s23 + $0x38] sm:$0xff] %v462_v31 }
 0x181   : > { %v527_v15 = vpop.f32.mrf.mxu2 }
 0x182   : > { %v528_v16 = vadd.f32 %v527_v15, %v1236_v2 }
 0x184   : > { %829 = vst [vmem:[%s1228_s23 + $0x98] sm:$0xff] %v528_v16  ;;  %v464_v36 = vpop.f32.mrf.mxu1 }
 0x185   : > { %v465_v37 = vadd.f32 %v464_v36, %v1225_v61 }
 0x187   : > { %492 = vst [vmem:[%s1228_s23 + $0x40] sm:$0xff] %v465_v37 }
 0x189   : > { %v597_v20 = vpop.f32.mrf.mxu3  ;;  %v530_v21 = vpop.f32.mrf.mxu2 }
 0x18a   : > { %v598_v22 = vadd.f32 %v597_v20, %v1256_v19  ;;  %v531_v23 = vadd.f32 %v530_v21, %v1236_v2 }
 0x18c   : > { %850 = vst [vmem:[%s1228_s23 + $0x100] sm:$0xff] %v598_v22  ;;  %v466_v42 = vpop.f32.mrf.mxu1 }
 0x18d   : > { %830 = vst [vmem:[%s1228_s23 + $0xa0] sm:$0xff] %v531_v23  ;;  %v467_v43 = vadd.f32 %v466_v42, %v1225_v61 }
 0x18f   : > { %493 = vst [vmem:[%s1228_s23 + $0x48] sm:$0xff] %v467_v43 }
 0x191   : > { %v599_v26 = vpop.f32.mrf.mxu3  ;;  %v532_v27 = vpop.f32.mrf.mxu2 }
 0x192   : > { %v600_v28 = vadd.f32 %v599_v26, %v1256_v19  ;;  %v533_v29 = vadd.f32 %v532_v27, %v1236_v2 }
 0x194   : > { %851 = vst [vmem:[%s1228_s23 + $0x108] sm:$0xff] %v600_v28  ;;  %v469_v48 = vpop.f32.mrf.mxu1 }
 0x195   : > { %831 = vst [vmem:[%s1228_s23 + $0xa8] sm:$0xff] %v533_v29  ;;  %v470_v49 = vadd.f32 %v469_v48, %v1225_v61 }
 0x197   : > { %494 = vst [vmem:[%s1228_s23 + $0x50] sm:$0xff] %v470_v49 }
 0x199   : > { %v602_v32 = vpop.f32.mrf.mxu3  ;;  %v535_v33 = vpop.f32.mrf.mxu2 }
 0x19a   : > { %v603_v34 = vadd.f32 %v602_v32, %v1256_v19  ;;  %v536_v35 = vadd.f32 %v535_v33, %v1236_v2 }
 0x19c   : > { %852 = vst [vmem:[%s1228_s23 + $0x110] sm:$0xff] %v603_v34  ;;  %v471_v54 = vpop.f32.mrf.mxu1 }
 0x19d   : > { %832 = vst [vmem:[%s1228_s23 + $0xb0] sm:$0xff] %v536_v35  ;;  %v472_v55 = vadd.f32 %v471_v54, %v1225_v61 }
 0x19f   : > { %495 = vst [vmem:[%s1228_s23 + $0x58] sm:$0xff] %v472_v55 }
 0x1a1   : > { %v604_v38 = vpop.f32.mrf.mxu3  ;;  %v537_v39 = vpop.f32.mrf.mxu2 }
 0x1a2   : > { %v605_v40 = vadd.f32 %v604_v38, %v1256_v19  ;;  %v538_v41 = vadd.f32 %v537_v39, %v1236_v2 }
 0x1a4   : > { %853 = vst [vmem:[%s1228_s23 + $0x118] sm:$0xff] %v605_v40  ;;  %v474_v60 = vpop.f32.mrf.mxu1 }
 0x1a5   : > { %833 = vst [vmem:[%s1228_s23 + $0xb8] sm:$0xff] %v538_v41  ;;  %v475_v62 = vadd.f32 %v474_v60, %v1225_v61 }
 0x1a7   : > { %496 = vst [vmem:[%s1228_s23 + $0x60] sm:$0xff] %v475_v62 }
 0x1a9   : > { %v607_v44 = vpop.f32.mrf.mxu3  ;;  %v540_v45 = vpop.f32.mrf.mxu2 }
 0x1aa   : > { %v608_v46 = vadd.f32 %v607_v44, %v1256_v19  ;;  %v541_v47 = vadd.f32 %v540_v45, %v1236_v2 }
 0x1ac   : > { %854 = vst [vmem:[%s1228_s23 + $0x120] sm:$0xff] %v608_v46  ;;  %v476_v4 = vpop.f32.mrf.mxu1 }
 0x1ad   : > { %834 = vst [vmem:[%s1228_s23 + $0xc0] sm:$0xff] %v541_v47  ;;  %v477_v5 = vadd.f32 %v476_v4, %v1225_v61 }
 0x1af   : > { %497 = vst [vmem:[%s1228_s23 + $0x68] sm:$0xff] %v477_v5 }
 0x1b1   : > { %v609_v50 = vpop.f32.mrf.mxu3  ;;  %v542_v51 = vpop.f32.mrf.mxu2 }
 0x1b2   : > { %v610_v52 = vadd.f32 %v609_v50, %v1256_v19  ;;  %v543_v53 = vadd.f32 %v542_v51, %v1236_v2 }
 0x1b4   : > { %855 = vst [vmem:[%s1228_s23 + $0x128] sm:$0xff] %v610_v52  ;;  %v479_v10 = vpop.f32.mrf.mxu1 }
 0x1b5   : > { %835 = vst [vmem:[%s1228_s23 + $0xc8] sm:$0xff] %v543_v53  ;;  %v480_v11 = vadd.f32 %v479_v10, %v1225_v61 }
 0x1b7   : > { %498 = vst [vmem:[%s1228_s23 + $0x70] sm:$0xff] %v480_v11 }
 0x1b9   : > { %v612_v56 = vpop.f32.mrf.mxu3  ;;  %v545_v57 = vpop.f32.mrf.mxu2 }
 0x1ba   : > { %v613_v58 = vadd.f32 %v612_v56, %v1256_v19  ;;  %v546_v59 = vadd.f32 %v545_v57, %v1236_v2 }
 0x1bc   : > { %856 = vst [vmem:[%s1228_s23 + $0x130] sm:$0xff] %v613_v58  ;;  %v481_v16 = vpop.f32.mrf.mxu1 }
 0x1bd   : > { %836 = vst [vmem:[%s1228_s23 + $0xd0] sm:$0xff] %v546_v59  ;;  %v482_v17 = vadd.f32 %v481_v16, %v1225_v61 }
 0x1bf   : > { %499 = vst [vmem:[%s1228_s23 + $0x78] sm:$0xff] %v482_v17 }
 0x1c1   : > { %v614_v63 = vpop.f32.mrf.mxu3  ;;  %v547_v0 = vpop.f32.mrf.mxu2 }
 0x1c2   : > { %v615_v1 = vadd.f32 %v614_v63, %v1256_v19  ;;  %v548_v3 = vadd.f32 %v547_v0, %v1236_v2 }
 0x1c4   : > { %857 = vst [vmem:[%s1228_s23 + $0x138] sm:$0xff] %v615_v1 }
 0x1c5   : > { %837 = vst [vmem:[%s1228_s23 + $0xd8] sm:$0xff] %v548_v3 }
 0x1c9   : > { %v617_v6 = vpop.f32.mrf.mxu3  ;;  %v550_v7 = vpop.f32.mrf.mxu2 }
 0x1ca   : > { %v618_v8 = vadd.f32 %v617_v6, %v1256_v19  ;;  %v551_v9 = vadd.f32 %v550_v7, %v1236_v2 }
 0x1cc   : > { %858 = vst [vmem:[%s1228_s23 + $0x140] sm:$0xff] %v618_v8 }
 0x1cd   : > { %838 = vst [vmem:[%s1228_s23 + $0xe0] sm:$0xff] %v551_v9 }
 0x1d1   : > { %v619_v12 = vpop.f32.mrf.mxu3  ;;  %v552_v13 = vpop.f32.mrf.mxu2 }
 0x1d2   : > { %v620_v14 = vadd.f32 %v619_v12, %v1256_v19  ;;  %v553_v15 = vadd.f32 %v552_v13, %v1236_v2 }
 0x1d4   : > { %859 = vst [vmem:[%s1228_s23 + $0x148] sm:$0xff] %v620_v14 }
 0x1d5   : > { %839 = vst [vmem:[%s1228_s23 + $0xe8] sm:$0xff] %v553_v15 }
 0x1d9   : > { %v622_v18 = vpop.f32.mrf.mxu3  ;;  %v555_v20 = vpop.f32.mrf.mxu2 }
 0x1da   : > { %v623_v21 = vadd.f32 %v622_v18, %v1256_v19  ;;  %v556_v22 = vadd.f32 %v555_v20, %v1236_v2 }
 0x1dc   : > { %860 = vst [vmem:[%s1228_s23 + $0x150] sm:$0xff] %v623_v21 }
 0x1dd   : > { %840 = vst [vmem:[%s1228_s23 + $0xf0] sm:$0xff] %v556_v22 }
 0x1e1   : > { %v624_v23 = vpop.f32.mrf.mxu3  ;;  %v557_v24 = vpop.f32.mrf.mxu2 }
 0x1e2   : > { %v625_v25 = vadd.f32 %v624_v23, %v1256_v19  ;;  %v558_v61 = vadd.f32 %v557_v24, %v1236_v2 }
 0x1e4   : > { %861 = vst [vmem:[%s1228_s23 + $0x158] sm:$0xff] %v625_v25 }
 0x1e5   : > { %841 = vst [vmem:[%s1228_s23 + $0xf8] sm:$0xff] %v558_v61 }
 0x1e9   : > { %v627_v26 = vpop.f32.mrf.mxu3 }
 0x1ea   : > { %v628_v27 = vadd.f32 %v627_v26, %v1256_v19 }
 0x1ec   : > { %862 = vst [vmem:[%s1228_s23 + $0x160] sm:$0xff] %v628_v27 }
 0x1f1   : > { %v629_v28 = vpop.f32.mrf.mxu3 }
 0x1f2   : > { %v630_v29 = vadd.f32 %v629_v28, %v1256_v19 }
 0x1f4   : > { %863 = vst [vmem:[%s1228_s23 + $0x168] sm:$0xff] %v630_v29 }
 0x1f9   : > { %v632_v30 = vpop.f32.mrf.mxu3 }
 0x1fa   : > { %v633_v31 = vadd.f32 %v632_v30, %v1256_v19 }
 0x1fc   : > { %864 = vst [vmem:[%s1228_s23 + $0x170] sm:$0xff] %v633_v31 }
 0x201   : > { %v634_v2 = vpop.f32.mrf.mxu3 }
 0x202   : > { %v635_v32 = vadd.f32 %v634_v2, %v1256_v19 }
 0x204   : > { %865 = vst [vmem:[%s1228_s23 + $0x178] sm:$0xff] %v635_v32 }
 0x205   : > { %1004 = shalt.err (!%p1001_p8)
}
 0x206   : > { %s1051_s16 = smov 128   ;;  %s1052_s23 = smov 8  }
 0x207   : > { %893 = dma.vmem_to_hbm [thread:$0]  (%p1121_p5), %s669_s7, 6144, %s671_s9, %s655_s10, %s1051_s16, %s1051_s16, %s1052_s23  }
 0x208 PF: > { %p910_p9 = scmp.ge.s32.totalorder %s1047_s21, 2  ;;  %s685_s8 = sand.u32 1, %s1035_s18  }
 0x209   : > { %s686_s6 = scalar_lea.sflag [#allocation3], %s685_s8 }
 0x20a   : > { %p903_p10 = pnand %p910_p9, %p1125_p6 }
 0x20c   : > { %p904_p11 = pneg %p903_p10 }
 0x20e   : > { %1030 = dma.done.wait (%p904_p11), %s686_s6, 6144  }
 0x20f   : > { %1032 = vsyncadd (%p904_p11), %s686_s6, 4294961152  ;;  %p17_p12 = scmp.ge.s32.totalorder %s1108_s24, 4   ;;  %s1377_s18 = smov %s1039_s19 }
 0x210   : > { %s1378_s19 = smov %s1043_s20  ;;  %s1379_s20 = smov %s1119_s27 }
 0x211   : > { %s1380_s21 = smov %s1108_s24  ;;  %19 = sbr.rel (!%p17_p12) target bundleno = 5 (0x5), region = 86 }
 0x216   :  { %692 = vsyncpa [#allocation3], 1 }
 0x217   :  { %694 = vsyncpa [#allocation3 + $0x1], 1 }
 0x218   :  { %695 = vsyncpa [#allocation4], 1 }
 0x219   :  { %697 = vsyncpa [#allocation4 + $0x1], 1 }
 0x21a   :  { %698 = vsyncpa [#allocation6], 1 }

</bundles_post_ra>
